<compile_context>
chip_gen: v5e
topology: v5e:2x2
jax: 0.10.0
libtpu: 0.0.40
codegen_flags: <defaults>
</compile_context>

<pallas_src>
import functools

import jax
import jax.numpy as jnp
from jax.experimental import pallas as pl
from jax.experimental.pallas import tpu as pltpu

# Logical layer sizes from the PyTorch module (kept unpadded inside the kernel).
H1, H2 = 400, 300
# Only the final output dim is lane-padded (multiple of 128) for dense stores.
OUT_PAD = 128


def _round_up(n, m):
    return ((n + m - 1) // m) * m


def _actor_kernel(max_action, x_ref, w1_ref, b1_ref, w2_ref, b2_ref,
                  w3_ref, b3_ref, o_ref):
    """Fused 3-layer MLP on one batch tile.

    MXU matmuls take bf16 inputs with f32 accumulation; bias-add / ReLU /
    tanh / scale stay in f32. Output stored bf16 (lane-dense slab).
    """
    x = x_ref[...]  # already bf16 (cast in the wrapper)

    # layer1: Linear(state_dim -> 400) + ReLU
    h1 = jnp.dot(x, w1_ref[...], preferred_element_type=jnp.float32)
    h1 = jnp.maximum(h1 + b1_ref[...], 0.0)

    # layer2: Linear(400 -> 300) + ReLU
    h2 = jnp.dot(h1.astype(jnp.bfloat16), w2_ref[...],
                 preferred_element_type=jnp.float32)
    h2 = jnp.maximum(h2 + b2_ref[...], 0.0)

    # layer3: Linear(300 -> 128-padded action_dim) + tanh * max_action
    h3 = jnp.dot(h2.astype(jnp.bfloat16), w3_ref[...],
                 preferred_element_type=jnp.float32)
    o_ref[...] = (jnp.tanh(h3 + b3_ref[...]) * max_action).astype(o_ref.dtype)


def init_actor_params(key, state_dim, action_dim):
    """Deterministic synthetic init matching nn.Linear shapes.

    Stored transposed relative to PyTorch (as [in, out]) so the kernel does
    x @ W directly. Biases kept 2-D ([1, out]).
    """
    k1, k2, k3, k4, k5, k6 = jax.random.split(key, 6)

    def uniform_init(k, shape, fan_in):
        bound = 1.0 / jnp.sqrt(fan_in)
        return jax.random.uniform(k, shape, jnp.float32, -bound, bound)

    return {
        "w1": uniform_init(k1, (state_dim, H1), state_dim),
        "b1": uniform_init(k2, (1, H1), state_dim),
        "w2": uniform_init(k3, (H1, H2), H1),
        "b2": uniform_init(k4, (1, H2), H1),
        "w3": uniform_init(k5, (H2, action_dim), H2),
        "b3": uniform_init(k6, (1, action_dim), H2),
    }


def prepare_actor_params(params):
    """Weights -> bf16. Hidden dims stay unpadded (full-array blocks); only the
    final output dim is zero-padded to 128 lanes. Biases stay f32."""
    action_dim = params["w3"].shape[1]
    assert action_dim <= OUT_PAD, "action_dim must fit in one 128-lane tile"
    pad_out = OUT_PAD - action_dim
    return {
        "w1": params["w1"].astype(jnp.bfloat16),
        "b1": params["b1"],
        "w2": params["w2"].astype(jnp.bfloat16),
        "b2": params["b2"],
        "w3": jnp.pad(params["w3"], ((0, 0), (0, pad_out))).astype(jnp.bfloat16),
        "b3": jnp.pad(params["b3"], ((0, 0), (0, pad_out))),
    }


def actor_forward(x, padded_params, action_dim, max_action, *, batch_tile=1024):
    """x: [B, state_dim] float32. padded_params: output of prepare_actor_params."""
    w1, b1 = padded_params["w1"], padded_params["b1"]
    w2, b2 = padded_params["w2"], padded_params["b2"]
    w3, b3 = padded_params["w3"], padded_params["b3"]

    B, S = x.shape

    # Balanced batch tiles: every tile identical, minimal padding on the last.
    n_tiles = max(1, pl.cdiv(B, batch_tile))
    # At larger batches keep >= 2 balanced "parallel" tiles so both v7x
    # TensorCores get work (pure no-op on single-TC v5e/v6e).
    if n_tiles == 1 and B >= 1024:
        n_tiles = 2
    tb = _round_up(pl.cdiv(B, n_tiles), 8)
    b_pad = tb * n_tiles

    x_p = x
    if b_pad != B:
        x_p = jnp.pad(x_p, ((0, b_pad - B), (0, 0)))
    # Pre-cast to bf16: halves x HBM read and removes the in-kernel cast pass.
    x_p = x_p.astype(jnp.bfloat16)

    weight_bytes = sum(int(a.size) * a.dtype.itemsize
                       for a in (w1, b1, w2, b2, w3, b3))
    # Cost reflects the padded work actually executed by the kernel.
    cost = pl.CostEstimate(
        flops=2 * b_pad * (S * H1 + H1 * H2 + H2 * OUT_PAD),
        transcendentals=b_pad * OUT_PAD,
        bytes_accessed=weight_bytes + int(x_p.size) * 2 + b_pad * OUT_PAD * 2,
    )

    out = pl.pallas_call(
        functools.partial(_actor_kernel, float(max_action)),
        out_shape=jax.ShapeDtypeStruct((b_pad, OUT_PAD), jnp.bfloat16),
        grid=(n_tiles,),
        in_specs=[
            pl.BlockSpec((tb, S), lambda i: (i, 0)),        # x: tiled over batch
            pl.BlockSpec((S, H1), lambda i: (0, 0)),        # weights: resident,
            pl.BlockSpec((1, H1), lambda i: (0, 0)),        #   full-array blocks
            pl.BlockSpec((H1, H2), lambda i: (0, 0)),
            pl.BlockSpec((1, H2), lambda i: (0, 0)),
            pl.BlockSpec((H2, OUT_PAD), lambda i: (0, 0)),
            pl.BlockSpec((1, OUT_PAD), lambda i: (0, 0)),
        ],
        out_specs=pl.BlockSpec((tb, OUT_PAD), lambda i: (i, 0)),
        compiler_params=pltpu.CompilerParams(
            dimension_semantics=("parallel",),
            vmem_limit_bytes=32 * 1024 * 1024,
        ),
        cost_estimate=cost,
    )(x_p, w1, b1, w2, b2, w3, b3)

    # Strip batch/lane padding; return f32 like the PyTorch module.
    return out[:B, :action_dim].astype(jnp.float32)


def actor_reference(x, params, max_action):
    """Pure-JAX f32 reference for correctness checking."""
    h = jnp.maximum(x @ params["w1"] + params["b1"], 0.0)
    h = jnp.maximum(h @ params["w2"] + params["b2"], 0.0)
    return jnp.tanh(h @ params["w3"] + params["b3"]) * max_action


if __name__ == "__main__":
    state_dim = 32
    action_dim = 8
    max_action = 2.0

    key = jax.random.PRNGKey(0)
    k_params, k_x1, k_x2 = jax.random.split(key, 3)

    params = init_actor_params(k_params, state_dim, action_dim)
    padded = prepare_actor_params(params)

    # Small batch (single tile, grid=1).
    x_small = jax.random.normal(k_x1, (2, state_dim), jnp.float32)
    out_small = jax.block_until_ready(
        actor_forward(x_small, padded, action_dim, max_action))
    ref_small = actor_reference(x_small, params, max_action)
    assert out_small.shape == (2, action_dim)
    # bf16 matmul inputs / bf16 output slab (f32 accumulate): loosened tolerance.
    assert jnp.allclose(out_small, ref_small, atol=5e-2, rtol=5e-2), \
        "mismatch vs reference (small batch)"

    # Medium batch, default tiling -> single balanced tile (grid=1).
    x_big = jax.random.normal(k_x2, (300, state_dim), jnp.float32)
    out_big = jax.block_until_ready(
        actor_forward(x_big, padded, action_dim, max_action))
    ref_big = actor_reference(x_big, params, max_action)
    assert out_big.shape == (300, action_dim)
    assert jnp.allclose(out_big, ref_big, atol=5e-2, rtol=5e-2), \
        "mismatch vs reference (single balanced tile)"

    # Same batch, forced small batch_tile -> 3 balanced tiles (grid=3) to
    # exercise the multi-tile + padded-tail path.
    out_tiled = jax.block_until_ready(
        actor_forward(x_big, padded, action_dim, max_action, batch_tile=128))
    assert out_tiled.shape == (300, action_dim)
    assert jnp.allclose(out_tiled, ref_big, atol=5e-2, rtol=5e-2), \
        "mismatch vs reference (multi-tile batch)"

    print("KERNEL_OK")
</pallas_src>

<mosaic_0001>
module attributes {stable_mosaic.version = 11 : i64} {
  func.func @_actor_kernel(%arg0: i32, %arg1: memref<8x32xbf16, #tpu.memory_space<vmem>>, %arg2: memref<32x400xbf16, #tpu.memory_space<vmem>>, %arg3: memref<1x400xf32, #tpu.memory_space<vmem>>, %arg4: memref<400x300xbf16, #tpu.memory_space<vmem>>, %arg5: memref<1x300xf32, #tpu.memory_space<vmem>>, %arg6: memref<300x128xbf16, #tpu.memory_space<vmem>>, %arg7: memref<1x128xf32, #tpu.memory_space<vmem>>, %arg8: memref<8x128xbf16, #tpu.memory_space<vmem>>) attributes {dimension_semantics = [#tpu.dimension_semantics<parallel>], iteration_bounds = array<i64: 1>, scalar_prefetch = 0 : i64, scratch_operands = 0 : i64, tpu.core_type = #tpu.core_type<tc>, window_params = [{transform_indices = @transform_0, window_bounds = array<i64: 8, 32>}, {pipeline_mode = #tpu.pipeline_mode<synchronous>, transform_indices = @transform_1, window_bounds = array<i64: 32, 400>}, {pipeline_mode = #tpu.pipeline_mode<synchronous>, transform_indices = @transform_2, window_bounds = array<i64: 1, 400>}, {pipeline_mode = #tpu.pipeline_mode<synchronous>, transform_indices = @transform_3, window_bounds = array<i64: 400, 300>}, {pipeline_mode = #tpu.pipeline_mode<synchronous>, transform_indices = @transform_4, window_bounds = array<i64: 1, 300>}, {pipeline_mode = #tpu.pipeline_mode<synchronous>, transform_indices = @transform_5, window_bounds = array<i64: 300, 128>}, {pipeline_mode = #tpu.pipeline_mode<synchronous>, transform_indices = @transform_6, window_bounds = array<i64: 1, 128>}, {transform_indices = @transform_7, window_bounds = array<i64: 8, 128>}]} {
    %c0 = arith.constant 0 : index
    %c0_0 = arith.constant 0 : index
    %0 = vector.load %arg1[%c0, %c0_0] : memref<8x32xbf16, #tpu.memory_space<vmem>>, vector<8x32xbf16>
    %c0_1 = arith.constant 0 : index
    %c0_2 = arith.constant 0 : index
    %1 = vector.load %arg2[%c0_1, %c0_2] : memref<32x400xbf16, #tpu.memory_space<vmem>>, vector<32x400xbf16>
    %cst = arith.constant dense<0.000000e+00> : vector<8x400xf32>
    %2 = tpu.matmul %0, %1, %cst {dimension_numbers = #tpu.dot_dimension_numbers<[1], [0], [0], [1], [0, 0, 1, 1], [], []>} : vector<8x32xbf16>, vector<32x400xbf16>, vector<8x400xf32> -> vector<8x400xf32>
    %c0_3 = arith.constant 0 : index
    %c0_4 = arith.constant 0 : index
    %3 = vector.load %arg3[%c0_3, %c0_4] : memref<1x400xf32, #tpu.memory_space<vmem>>, vector<1x400xf32>
    %4 = vector.broadcast %3 : vector<1x400xf32> to vector<8x400xf32>
    %5 = arith.addf %2, %4 : vector<8x400xf32>
    %cst_5 = arith.constant 0.000000e+00 : f32
    %6 = vector.broadcast %cst_5 : f32 to vector<8x400xf32>
    %7 = arith.maximumf %5, %6 : vector<8x400xf32>
    %8 = arith.truncf %7 : vector<8x400xf32> to vector<8x400xbf16>
    %c0_6 = arith.constant 0 : index
    %c0_7 = arith.constant 0 : index
    %9 = vector.load %arg4[%c0_6, %c0_7] : memref<400x300xbf16, #tpu.memory_space<vmem>>, vector<400x300xbf16>
    %cst_8 = arith.constant dense<0.000000e+00> : vector<8x300xf32>
    %10 = tpu.matmul %8, %9, %cst_8 {dimension_numbers = #tpu.dot_dimension_numbers<[1], [0], [0], [1], [0, 0, 1, 1], [], []>} : vector<8x400xbf16>, vector<400x300xbf16>, vector<8x300xf32> -> vector<8x300xf32>
    %c0_9 = arith.constant 0 : index
    %c0_10 = arith.constant 0 : index
    %11 = vector.load %arg5[%c0_9, %c0_10] : memref<1x300xf32, #tpu.memory_space<vmem>>, vector<1x300xf32>
    %12 = vector.broadcast %11 : vector<1x300xf32> to vector<8x300xf32>
    %13 = arith.addf %10, %12 : vector<8x300xf32>
    %cst_11 = arith.constant 0.000000e+00 : f32
    %14 = vector.broadcast %cst_11 : f32 to vector<8x300xf32>
    %15 = arith.maximumf %13, %14 : vector<8x300xf32>
    %16 = arith.truncf %15 : vector<8x300xf32> to vector<8x300xbf16>
    %c0_12 = arith.constant 0 : index
    %c0_13 = arith.constant 0 : index
    %17 = vector.load %arg6[%c0_12, %c0_13] : memref<300x128xbf16, #tpu.memory_space<vmem>>, vector<300x128xbf16>
    %cst_14 = arith.constant dense<0.000000e+00> : vector<8x128xf32>
    %18 = tpu.matmul %16, %17, %cst_14 {dimension_numbers = #tpu.dot_dimension_numbers<[1], [0], [0], [1], [0, 0, 1, 1], [], []>} : vector<8x300xbf16>, vector<300x128xbf16>, vector<8x128xf32> -> vector<8x128xf32>
    %c0_15 = arith.constant 0 : index
    %c0_16 = arith.constant 0 : index
    %19 = vector.load %arg7[%c0_15, %c0_16] : memref<1x128xf32, #tpu.memory_space<vmem>>, vector<1x128xf32>
    %20 = vector.broadcast %19 : vector<1x128xf32> to vector<8x128xf32>
    %21 = arith.addf %18, %20 : vector<8x128xf32>
    %22 = math.tanh %21 : vector<8x128xf32>
    %cst_17 = arith.constant 2.000000e+00 : f32
    %23 = vector.broadcast %cst_17 : f32 to vector<8x128xf32>
    %24 = arith.mulf %22, %23 : vector<8x128xf32>
    %25 = arith.truncf %24 : vector<8x128xf32> to vector<8x128xbf16>
    %c0_18 = arith.constant 0 : index
    %c0_19 = arith.constant 0 : index
    %26 = vector.load %arg8[%c0_18, %c0_19] : memref<8x128xbf16, #tpu.memory_space<vmem>>, vector<8x128xbf16>
    tpu.vector_store %arg8[%c0_18, %c0_19], %25 {strides = array<i32>} : memref<8x128xbf16, #tpu.memory_space<vmem>>, vector<8x128xbf16>,
    return
  }
  func.func @transform_0(%arg0: i32) -> (i32, i32) {
    %c0_i32 = arith.constant 0 : i32
    %c0_i32_0 = arith.constant 0 : i32
    return %arg0, %c0_i32 : i32, i32
  }
  func.func @transform_1(%arg0: i32) -> (i32, i32) {
    %c0_i32 = arith.constant 0 : i32
    %c0_i32_0 = arith.constant 0 : i32
    %c0_i32_1 = arith.constant 0 : i32
    return %c0_i32, %c0_i32_0 : i32, i32
  }
  func.func @transform_2(%arg0: i32) -> (i32, i32) {
    %c0_i32 = arith.constant 0 : i32
    %c0_i32_0 = arith.constant 0 : i32
    %c0_i32_1 = arith.constant 0 : i32
    return %c0_i32, %c0_i32_0 : i32, i32
  }
  func.func @transform_3(%arg0: i32) -> (i32, i32) {
    %c0_i32 = arith.constant 0 : i32
    %c0_i32_0 = arith.constant 0 : i32
    %c0_i32_1 = arith.constant 0 : i32
    return %c0_i32, %c0_i32_0 : i32, i32
  }
  func.func @transform_4(%arg0: i32) -> (i32, i32) {
    %c0_i32 = arith.constant 0 : i32
    %c0_i32_0 = arith.constant 0 : i32
    %c0_i32_1 = arith.constant 0 : i32
    return %c0_i32, %c0_i32_0 : i32, i32
  }
  func.func @transform_5(%arg0: i32) -> (i32, i32) {
    %c0_i32 = arith.constant 0 : i32
    %c0_i32_0 = arith.constant 0 : i32
    %c0_i32_1 = arith.constant 0 : i32
    return %c0_i32, %c0_i32_0 : i32, i32
  }
  func.func @transform_6(%arg0: i32) -> (i32, i32) {
    %c0_i32 = arith.constant 0 : i32
    %c0_i32_0 = arith.constant 0 : i32
    %c0_i32_1 = arith.constant 0 : i32
    return %c0_i32, %c0_i32_0 : i32, i32
  }
  func.func @transform_7(%arg0: i32) -> (i32, i32) {
    %c0_i32 = arith.constant 0 : i32
    %c0_i32_0 = arith.constant 0 : i32
    return %arg0, %c0_i32 : i32, i32
  }
}

</mosaic_0001>

<bundles_post_ra>
// kernel: tpu_custom_call.1
= control target key start
LH: loop header
LB: loop body
LE: loop exit
PB: predicated region body
PF: predicated region fallthrough
CT: control target
= control target key end

     0   :  { %12 = vsyncpa [#allocation3], 0  ;;  %s1912_s0 = inlined_call_operand.hbm [shape: bf16[8,32], index: 0, kind: input, shape index: {}]   ;;  %s1913_s1 = inlined_call_operand.hbm [shape: bf16[32,400], index: 1, kind: input, shape index: {}]   ;;  %s1914_s2 = inlined_call_operand.hbm [shape: f32[1,400], index: 2, kind: input, shape index: {}]   ;;  %s1915_s3 = inlined_call_operand.hbm [shape: bf16[400,300], index: 3, kind: input, shape index: {}]   ;;  %s1916_s4 = inlined_call_operand.vmem [shape: f32[1,300], index: 4, kind: input, shape index: {}]   ;;  %s1917_s5 = inlined_call_operand.hbm [shape: bf16[300,128], index: 5, kind: input, shape index: {}]   ;;  %s1918_s6 = inlined_call_operand.vmem [shape: f32[1,128], index: 6, kind: input, shape index: {}]   ;;  %s1919_s7 = inlined_call_operand.hbm [shape: bf16[8,128], index: 7, kind: output, shape index: {}]  }
   0x1   :  { %13 = vsyncpa [#allocation6], 0 }
   0x2   :  { %14 = vsyncpa [#allocation9], 0  ;;  %s31_s26 = sshll.u32 %s1913_s1, 4  ;;  %s32_s26 = int_to_ptr.hbm [resolvable:$true] %s31_s26 }
   0x3   :  { %15 = vsyncpa [#allocation4], 0  ;;  %s1809_s27 = smov [#allocation5]   ;;  %s55_s8 = sshll.u32 %s1915_s3, 4  ;;  %s56_s8 = int_to_ptr.hbm [resolvable:$true] %s55_s8 }
   0x4   :  { %s33_s28 = sshll.u32 %s1809_s27, 4  ;;  %s1810_s9 = smov 256   ;;  %s34_s28 = int_to_ptr.vmem [resolvable:$true] %s33_s28 }
   0x5   :  { %s1811_s10 = smov 16   ;;  %s1812_s11 = smov [#allocation8]  }
   0x6   :  { %39 = dma.hbm_to_vmem [thread:$0]  %s32_s26, 1024, %s34_s28, [#allocation6], %s1810_s9, %s1810_s9, %s1811_s10  }
   0x7   :  { %s57_s12 = sshll.u32 %s1812_s11, 4  ;;  %s1813_s13 = smov 192   ;;  %s58_s12 = int_to_ptr.vmem [resolvable:$true] %s57_s12 }
   0x8   :  { %s1814_s14 = smov 12   ;;  %s21_s16 = sshll.u32 %s1912_s0, 4  ;;  %s22_s16 = int_to_ptr.hbm [resolvable:$true] %s21_s16 }
   0x9   :  { %63 = dma.hbm_to_vmem [thread:$0]  %s56_s8, 9600, %s58_s12, [#allocation9], %s1813_s13, %s1813_s13, %s1814_s14  }
   0xa   :  { %s1815_s17 = smov [#allocation2]   ;;  %s45_s20 = sshll.u32 %s1914_s2, 4  ;;  %s46_s20 = int_to_ptr.hbm [resolvable:$true] %s45_s20 }
   0xb   :  { %s23_s18 = sshll.u32 %s1815_s17, 4  ;;  %s1816_s21 = smov [#allocation7]   ;;  %s24_s18 = int_to_ptr.vmem [resolvable:$true] %s23_s18 }
   0xc   :  { %26 = dma.hbm_to_vmem [thread:$0]  %s22_s16, 64, %s24_s18, [#allocation3]  }
   0xd   :  { %s47_s22 = sshll.u32 %s1816_s21, 4  ;;  %s70_s25 = sshll.u32 %s1917_s5, 4  ;;  %s48_s22 = int_to_ptr.vmem [resolvable:$true] %s47_s22  ;;  %s71_s25 = int_to_ptr.hbm [resolvable:$true] %s70_s25 }
   0xe   :  { %50 = dma.hbm_to_vmem [thread:$0]  %s46_s20, 64, %s48_s22, [#allocation6]  }
   0xf   :  { %s1817_s0 = smov [#allocation10]   ;;  %s1818_s27 = smov 64  }
  0x10   :  { %s72_s26 = sshll.u32 %s1817_s0, 4  ;;  %s1819_s28 = smov 4   ;;  %s73_s26 = int_to_ptr.vmem [resolvable:$true] %s72_s26 }
  0x11   :  { %78 = dma.hbm_to_vmem [thread:$0]  %s71_s25, 2432, %s73_s26, [#allocation9], %s1818_s27, %s1818_s27, %s1819_s28  }
  0x12   :  { %1801 = dma.done.wait [#allocation3], 64  }
  0x13   :  { %1802 = vsyncadd [#allocation3], 4294967232 }
  0x14   :  { %1803 = dma.done.wait [#allocation6], 1088  }
  0x15   :  { %1804 = vsyncadd [#allocation6], 4294966208 }
  0x16   :  { %1805 = dma.done.wait [#allocation9], 12032  }
  0x17   :  { %1806 = vsyncadd [#allocation9], 4294955264  ;;  %v1142_v0 = vld [vmem:[#allocation5 + $0x20] sm:$0xf]  ;;  %v1546_v1 = vld [vmem:[#allocation5 + $0x2c] sm:$0xf0] }
  0x18   :  { %v1544_v2 = vld [vmem:[#allocation5 + $0x24] sm:$0xf]  ;;  %v1143_v3 = vor.u32 %v1546_v1, %v1142_v0  ;;  %v1144_v4 = vld [vmem:[#allocation5 + $0x30] sm:$0xf0]  ;;  %v1150_v5 = vld [vmem:[#allocation5 + $0x28] sm:$0xf] }
  0x19   :  { %v1547_v6 = vld [vmem:[#allocation5 + $0x34] sm:$0xf0]  ;;  %v1147_v7 = vor.u32 %v1544_v2, %v1144_v4  ;;  %v1545_v9 = vld [vmem:[#allocation5 + $0x2c] sm:$0xf]  ;;  %v1152_v10 = vld [vmem:[#allocation5 + $0x38] sm:$0xf0] }
  0x1a   :  { %v1151_v8 = vor.u32 %v1547_v6, %v1150_v5  ;;  %v1126_v11 = vld [vmem:[#allocation5] sm:$0xf]  ;;  %171 = vmatpush.bf16.msra.mxu0 %v1143_v3  ;;  %v1155_v12 = vor.u32 %v1545_v9, %v1152_v10  ;;  %v1542_v13 = vld [vmem:[#allocation5 + $0xc] sm:$0xf0]  ;;  %v1540_v14 = vld [vmem:[#allocation5 + $0x4] sm:$0xf] }
  0x1b   :  { %v1128_v15 = vld [vmem:[#allocation5 + $0x10] sm:$0xf0]  ;;  %184 = vmatpush.bf16.msra.mxu1 %v1147_v7  ;;  %v1127_v16 = vor.u32 %v1542_v13, %v1126_v11  ;;  %v1134_v18 = vld [vmem:[#allocation5 + $0x8] sm:$0xf]  ;;  %v1543_v19 = vld [vmem:[#allocation5 + $0x14] sm:$0xf0] }
  0x1c   :  { %197 = vmatpush.bf16.msra.mxu2 %v1151_v8  ;;  %v1131_v17 = vor.u32 %v1540_v14, %v1128_v15  ;;  %v1541_v20 = vld [vmem:[#allocation5 + $0xc] sm:$0xf]  ;;  %210 = vmatpush.bf16.msra.mxu3 %v1155_v12  ;;  %v1135_v21 = vor.u32 %v1543_v19, %v1134_v18  ;;  %v1136_v22 = vld [vmem:[#allocation5 + $0x18] sm:$0xf0]  ;;  %v1570_v25 = vld [vmem:[#allocation8 + $0xb0] sm:$0xf0] }
  0x1d   :  { %v1246_v23 = vld [vmem:[#allocation8 + $0xa8] sm:$0xf]  ;;  %v1139_v24 = vor.u32 %v1541_v20, %v1136_v22  ;;  %v1234_v26 = vld [vmem:[#allocation8 + $0x90] sm:$0xf]  ;;  %v1567_v27 = vld [vmem:[#allocation8 + $0x98] sm:$0xf0] }
  0x1e   :  { %172 = vmatpush.bf16.msra.mxu0 %v1127_v16  ;;  %v102_v28 = vld [vmem:[#allocation2] sm:$0xf]  ;;  %vm161_vm0 = vcmask 261120   ;;  %v1247_v29 = vor.u32 %v1570_v25, %v1246_v23  ;;  %v1342_v30 = vld [vmem:[#allocation8 + $0x168] sm:$0xf]  ;;  %v1235_v32 = vor.u32 %v1567_v27, %v1234_v26  ;;  %vm733_vm1 = vcmask 130048  }
  0x1f   :  { %185 = vmatpush.bf16.msra.mxu1 %v1131_v17  ;;  %v1594_v31 = vld [vmem:[#allocation8 + $0x170] sm:$0xf0]  ;;  %v1330_v34 = vld [vmem:[#allocation8 + $0x150] sm:$0xf]  ;;  %v1222_v35 = vld [vmem:[#allocation8 + $0x78] sm:$0xf] }
  0x20   :  { %198 = vmatpush.bf16.msra.mxu2 %v1135_v21  ;;  %211 = vmatpush.bf16.msra.mxu3 %v1139_v24  ;;  %v1343_v33 = vor.u32 %v1594_v31, %v1342_v30  ;;  %v1564_v36 = vld [vmem:[#allocation8 + $0x80] sm:$0xf0]  ;;  %v1591_v37 = vld [vmem:[#allocation8 + $0x158] sm:$0xf0]  ;;  %v1318_v40 = vld [vmem:[#allocation8 + $0x138] sm:$0xf] }
  0x21   :  { %1156 = vmatmul.msk.bf16.vlgmr.msra.gmra.mxu0 %vm161_vm0, %v102_v28  ;;  %v1331_v38 = vor.u32 %v1591_v37, %v1330_v34  ;;  %v1223_v39 = vor.u32 %v1564_v36, %v1222_v35  ;;  %v1588_v41 = vld [vmem:[#allocation8 + $0x140] sm:$0xf0]  ;;  %v1210_v42 = vld [vmem:[#allocation8 + $0x60] sm:$0xf]  ;;  %v1561_v43 = vld [vmem:[#allocation8 + $0x68] sm:$0xf0] }
  0x22   :  { %737 = vmatpush.bf16.msrb.mxu0 %v1247_v29  ;;  %1157 = vmatmul.msk.bf16.vlgmr.msra.gmra.mxu1 %vm161_vm0, %v102_v28  ;;  %v1438_v44 = vld [vmem:[#allocation8 + $0x228] sm:$0xf]  ;;  %v1618_v45 = vld [vmem:[#allocation8 + $0x230] sm:$0xf0]  ;;  %v1319_v48 = vor.u32 %v1588_v41, %v1318_v40  ;;  %v1306_v49 = vld [vmem:[#allocation8 + $0x120] sm:$0xf]  ;;  %v1211_v52 = vor.u32 %v1561_v43, %v1210_v42 }
  0x23   :  { %1158 = vmatmul.msk.bf16.vlgmr.msra.gmra.mxu2 %vm161_vm0, %v102_v28  ;;  %1159 = vmatmul.msk.bf16.vlgmr.msra.gmra.mxu3 %vm161_vm0, %v102_v28  ;;  %v1198_v46 = vld [vmem:[#allocation8 + $0x48] sm:$0xf]  ;;  %v1558_v47 = vld [vmem:[#allocation8 + $0x50] sm:$0xf0]  ;;  %v1585_v50 = vld [vmem:[#allocation8 + $0x128] sm:$0xf0]  ;;  %v1439_v51 = vor.u32 %v1618_v45, %v1438_v44 }
  0x24   :  { %750 = vmatpush.bf16.msrb.mxu1 %v1343_v33  ;;  %v1450_v53 = vld [vmem:[#allocation8 + $0x240] sm:$0xf]  ;;  %v1621_v54 = vld [vmem:[#allocation8 + $0x248] sm:$0xf0]  ;;  %v1248_v57 = vld [vmem:[#allocation8 + $0xb4] sm:$0xf0]  ;;  %v1307_v62 = vor.u32 %v1585_v50, %v1306_v49  ;;  %v1199_v2 = vor.u32 %v1558_v47, %v1198_v46 }
  0x25   :  { %v1569_v55 = vld [vmem:[#allocation8 + $0xac] sm:$0xf]  ;;  %763 = vmatpush.bf16.msrb.mxu2 %v1439_v51  ;;  %v1451_v56 = vor.u32 %v1621_v54, %v1450_v53  ;;  %v1426_v58 = vld [vmem:[#allocation8 + $0x210] sm:$0xf]  ;;  %v1615_v59 = vld [vmem:[#allocation8 + $0x218] sm:$0xf0] }
  0x26   :  { %738 = vmatpush.bf16.msrb.mxu0 %v1235_v32  ;;  %v1251_v60 = vor.u32 %v1569_v55, %v1248_v57  ;;  %v1427_v61 = vor.u32 %v1615_v59, %v1426_v58  ;;  %v1294_v63 = vld [vmem:[#allocation8 + $0x108] sm:$0xf]  ;;  %v1566_v0 = vld [vmem:[#allocation8 + $0x94] sm:$0xf]  ;;  %v1236_v1 = vld [vmem:[#allocation8 + $0x9c] sm:$0xf0] }
  0x27   :  { %783 = vmatpush.bf16.msrb.mxu3 %v1451_v56  ;;  %v1582_v3 = vld [vmem:[#allocation8 + $0x110] sm:$0xf0]  ;;  %v1239_v4 = vor.u32 %v1566_v0, %v1236_v1  ;;  %v1414_v5 = vld [vmem:[#allocation8 + $0x1f8] sm:$0xf]  ;;  %v1612_v6 = vld [vmem:[#allocation8 + $0x200] sm:$0xf0] }
  0x28   :  { %751 = vmatpush.bf16.msrb.mxu1 %v1331_v38  ;;  %v1186_v7 = vld [vmem:[#allocation8 + $0x30] sm:$0xf]  ;;  %v1555_v8 = vld [vmem:[#allocation8 + $0x38] sm:$0xf0]  ;;  %v1415_v9 = vor.u32 %v1612_v6, %v1414_v5  ;;  %v1295_v11 = vor.u32 %v1582_v3, %v1294_v63  ;;  %v1224_v12 = vld [vmem:[#allocation8 + $0x84] sm:$0xf0] }
  0x29   :  { %764 = vmatpush.bf16.msrb.mxu2 %v1427_v61  ;;  %v1563_v10 = vld [vmem:[#allocation8 + $0x7c] sm:$0xf]  ;;  %v1402_v13 = vld [vmem:[#allocation8 + $0x1e0] sm:$0xf]  ;;  %v1609_v14 = vld [vmem:[#allocation8 + $0x1e8] sm:$0xf0]  ;;  %v1187_v15 = vor.u32 %v1555_v8, %v1186_v7 }
  0x2a   :  { %739 = vmatpush.bf16.msrb.mxu0 %v1223_v39  ;;  %v1174_v16 = vld [vmem:[#allocation8 + $0x18] sm:$0xf]  ;;  %v1282_v17 = vld [vmem:[#allocation8 + $0xf0] sm:$0xf]  ;;  %v1579_v18 = vld [vmem:[#allocation8 + $0xf8] sm:$0xf0]  ;;  %v1227_v19 = vor.u32 %v1563_v10, %v1224_v12  ;;  %v1403_v21 = vor.u32 %v1609_v14, %v1402_v13 }
  0x2b   :  { %789 = vmatpush.bf16.msra.mxu3 %v1251_v60  ;;  %v1552_v20 = vld [vmem:[#allocation8 + $0x20] sm:$0xf0]  ;;  %v1212_v23 = vld [vmem:[#allocation8 + $0x6c] sm:$0xf0]  ;;  %v1390_v24 = vld [vmem:[#allocation8 + $0x1c8] sm:$0xf]  ;;  %v1283_v26 = vor.u32 %v1579_v18, %v1282_v17 }
  0x2c   :  { %752 = vmatpush.bf16.msrb.mxu1 %v1319_v48  ;;  %v1560_v22 = vld [vmem:[#allocation8 + $0x64] sm:$0xf]  ;;  %v1606_v25 = vld [vmem:[#allocation8 + $0x1d0] sm:$0xf0]  ;;  %v1175_v27 = vor.u32 %v1552_v20, %v1174_v16  ;;  %v1270_v28 = vld [vmem:[#allocation8 + $0xd8] sm:$0xf] }
  0x2d   :  { %765 = vmatpush.bf16.msrb.mxu2 %v1415_v9  ;;  %v1576_v29 = vld [vmem:[#allocation8 + $0xe0] sm:$0xf0]  ;;  %v1215_v30 = vor.u32 %v1560_v22, %v1212_v23  ;;  %v1162_v31 = vld [vmem:[#allocation8] sm:$0xf]  ;;  %v1549_v32 = vld [vmem:[#allocation8 + $0x8] sm:$0xf0]  ;;  %v1391_v33 = vor.u32 %v1606_v25, %v1390_v24 }
  0x2e   :  { %740 = vmatpush.bf16.msrb.mxu0 %v1211_v52  ;;  %v1593_v34 = vld [vmem:[#allocation8 + $0x16c] sm:$0xf]  ;;  %v1344_v35 = vld [vmem:[#allocation8 + $0x174] sm:$0xf0]  ;;  %v1271_v36 = vor.u32 %v1576_v29, %v1270_v28  ;;  %v1163_v37 = vor.u32 %v1549_v32, %v1162_v31  ;;  %v1258_v38 = vld [vmem:[#allocation8 + $0xc0] sm:$0xf] }
  0x2f   :  { %790 = vmatpush.bf16.msra.mxu3 %v1239_v4  ;;  %v1573_v39 = vld [vmem:[#allocation8 + $0xc8] sm:$0xf0]  ;;  %v1347_v40 = vor.u32 %v1593_v34, %v1344_v35  ;;  %v1440_v42 = vld [vmem:[#allocation8 + $0x234] sm:$0xf0]  ;;  %v1590_v43 = vld [vmem:[#allocation8 + $0x154] sm:$0xf] }
  0x30   :  { %753 = vmatpush.bf16.msrb.mxu1 %v1307_v62  ;;  %v1617_v41 = vld [vmem:[#allocation8 + $0x22c] sm:$0xf]  ;;  %v1332_v44 = vld [vmem:[#allocation8 + $0x15c] sm:$0xf0]  ;;  %v1259_v45 = vor.u32 %v1573_v39, %v1258_v38  ;;  %v1614_v48 = vld [vmem:[#allocation8 + $0x214] sm:$0xf] }
  0x31   :  { %766 = vmatpush.bf16.msrb.mxu2 %v1403_v21  ;;  %v1443_v46 = vor.u32 %v1617_v41, %v1440_v42  ;;  %v1335_v47 = vor.u32 %v1590_v43, %v1332_v44  ;;  %v1428_v49 = vld [vmem:[#allocation8 + $0x21c] sm:$0xf0]  ;;  %v1587_v50 = vld [vmem:[#allocation8 + $0x13c] sm:$0xf]  ;;  %v1320_v51 = vld [vmem:[#allocation8 + $0x144] sm:$0xf0] }
  0x32   :  { %741 = vmatpush.bf16.msrb.mxu0 %v1199_v2  ;;  %v1431_v52 = vor.u32 %v1614_v48, %v1428_v49  ;;  %v1323_v53 = vor.u32 %v1587_v50, %v1320_v51  ;;  %v1584_v54 = vld [vmem:[#allocation8 + $0x124] sm:$0xf]  ;;  %v1308_v55 = vld [vmem:[#allocation8 + $0x12c] sm:$0xf0]  ;;  %v1581_v57 = vld [vmem:[#allocation8 + $0x10c] sm:$0xf] }
  0x33   :  { %791 = vmatpush.bf16.msra.mxu3 %v1227_v19  ;;  %v1311_v56 = vor.u32 %v1584_v54, %v1308_v55  ;;  %v1296_v58 = vld [vmem:[#allocation8 + $0x114] sm:$0xf0]  ;;  %v1578_v60 = vld [vmem:[#allocation8 + $0xf4] sm:$0xf]  ;;  %v1284_v61 = vld [vmem:[#allocation8 + $0xfc] sm:$0xf0] }
  0x34   :  { %754 = vmatpush.bf16.msrb.mxu1 %v1295_v11  ;;  %v1299_v59 = vor.u32 %v1581_v57, %v1296_v58  ;;  %v1287_v62 = vor.u32 %v1578_v60, %v1284_v61  ;;  %v1611_v63 = vld [vmem:[#allocation8 + $0x1fc] sm:$0xf]  ;;  %v1416_v0 = vld [vmem:[#allocation8 + $0x204] sm:$0xf0]  ;;  %v1557_v2 = vld [vmem:[#allocation8 + $0x4c] sm:$0xf] }
  0x35   :  { %767 = vmatpush.bf16.msrb.mxu2 %v1391_v33  ;;  %v1419_v1 = vor.u32 %v1611_v63, %v1416_v0  ;;  %v1200_v3 = vld [vmem:[#allocation8 + $0x54] sm:$0xf0]  ;;  %v1378_v5 = vld [vmem:[#allocation8 + $0x1b0] sm:$0xf]  ;;  %v1603_v6 = vld [vmem:[#allocation8 + $0x1b8] sm:$0xf0] }
  0x36   :  { %742 = vmatpush.bf16.msrb.mxu0 %v1187_v15  ;;  %v1203_v4 = vor.u32 %v1557_v2, %v1200_v3  ;;  %v1379_v7 = vor.u32 %v1603_v6, %v1378_v5  ;;  %v1575_v8 = vld [vmem:[#allocation8 + $0xdc] sm:$0xf]  ;;  %v1272_v9 = vld [vmem:[#allocation8 + $0xe4] sm:$0xf0]  ;;  %v1608_v11 = vld [vmem:[#allocation8 + $0x1e4] sm:$0xf] }
  0x37   :  { %792 = vmatpush.bf16.msra.mxu3 %v1215_v30  ;;  %v1275_v10 = vor.u32 %v1575_v8, %v1272_v9  ;;  %v1404_v12 = vld [vmem:[#allocation8 + $0x1ec] sm:$0xf0]  ;;  %v1554_v14 = vld [vmem:[#allocation8 + $0x34] sm:$0xf]  ;;  %v1188_v15 = vld [vmem:[#allocation8 + $0x3c] sm:$0xf0] }
  0x38   :  { %755 = vmatpush.bf16.msrb.mxu1 %v1283_v26  ;;  %v1407_v13 = vor.u32 %v1608_v11, %v1404_v12  ;;  %v1191_v16 = vor.u32 %v1554_v14, %v1188_v15  ;;  %v1366_v17 = vld [vmem:[#allocation8 + $0x198] sm:$0xf]  ;;  %v1600_v18 = vld [vmem:[#allocation8 + $0x1a0] sm:$0xf0]  ;;  %v1260_v21 = vld [vmem:[#allocation8 + $0xcc] sm:$0xf0] }
  0x39   :  { %768 = vmatpush.bf16.msrb.mxu2 %v1379_v7  ;;  %v1367_v19 = vor.u32 %v1600_v18, %v1366_v17  ;;  %v1572_v20 = vld [vmem:[#allocation8 + $0xc4] sm:$0xf]  ;;  %v1605_v23 = vld [vmem:[#allocation8 + $0x1cc] sm:$0xf]  ;;  %v1392_v24 = vld [vmem:[#allocation8 + $0x1d4] sm:$0xf0] }
  0x3a   :  { %743 = vmatpush.bf16.msrb.mxu0 %v1175_v27  ;;  %v1263_v22 = vor.u32 %v1572_v20, %v1260_v21  ;;  %v1395_v25 = vor.u32 %v1605_v23, %v1392_v24  ;;  %v1551_v26 = vld [vmem:[#allocation8 + $0x1c] sm:$0xf]  ;;  %v1176_v27 = vld [vmem:[#allocation8 + $0x24] sm:$0xf0]  ;;  %v1354_v28 = vld [vmem:[#allocation8 + $0x180] sm:$0xf] }
  0x3b   :  { %793 = vmatpush.bf16.msra.mxu3 %v1203_v4  ;;  %v1597_v29 = vld [vmem:[#allocation8 + $0x188] sm:$0xf0]  ;;  %v1179_v30 = vor.u32 %v1551_v26, %v1176_v27  ;;  %v1602_v32 = vld [vmem:[#allocation8 + $0x1b4] sm:$0xf]  ;;  %v1380_v33 = vld [vmem:[#allocation8 + $0x1bc] sm:$0xf0] }
  0x3c   :  { %756 = vmatpush.bf16.msrb.mxu1 %v1271_v36  ;;  %v1355_v31 = vor.u32 %v1597_v29, %v1354_v28  ;;  %v1383_v34 = vor.u32 %v1602_v32, %v1380_v33  ;;  %v1548_v35 = vld [vmem:[#allocation8 + $0x4] sm:$0xf]  ;;  %v1164_v36 = vld [vmem:[#allocation8 + $0xc] sm:$0xf0]  ;;  %v1599_v41 = vld [vmem:[#allocation8 + $0x19c] sm:$0xf] }
  0x3d   :  { %769 = vmatpush.bf16.msrb.mxu2 %v1367_v19  ;;  %v1620_v38 = vld [vmem:[#allocation8 + $0x244] sm:$0xf]  ;;  %v1452_v39 = vld [vmem:[#allocation8 + $0x24c] sm:$0xf0]  ;;  %v1368_v42 = vld [vmem:[#allocation8 + $0x1a4] sm:$0xf0] }
  0x3e   :  { %744 = vmatpush.bf16.msrb.mxu0 %v1163_v37  ;;  %v1167_v37 = vor.u32 %v1548_v35, %v1164_v36  ;;  %v1371_v43 = vor.u32 %v1599_v41, %v1368_v42  ;;  %v1596_v44 = vld [vmem:[#allocation8 + $0x184] sm:$0xf]  ;;  %v1619_v54 = vld [vmem:[#allocation8 + $0x238] sm:$0xf0]  ;;  %v1458_v60 = vld [vmem:[#allocation8 + $0x248] sm:$0xf] }
  0x3f   :  { %794 = vmatpush.bf16.msra.mxu3 %v1191_v16  ;;  %v1622_v61 = vld [vmem:[#allocation8 + $0x250] sm:$0xf0]  ;;  %v1434_v0 = vld [vmem:[#allocation8 + $0x218] sm:$0xf]  ;;  %v1254_v8 = vld [vmem:[#allocation8 + $0xb0] sm:$0xf] }
  0x40   :  { %757 = vmatpush.bf16.msrb.mxu1 %v1259_v45  ;;  %v1356_v45 = vld [vmem:[#allocation8 + $0x18c] sm:$0xf0]  ;;  %v1459_v2 = vor.u32 %v1622_v61, %v1458_v60  ;;  %v1571_v9 = vld [vmem:[#allocation8 + $0xb8] sm:$0xf0]  ;;  %v1422_v14 = vld [vmem:[#allocation8 + $0x200] sm:$0xf] }
  0x41   :  { %770 = vmatpush.bf16.msrb.mxu2 %v1355_v31  ;;  %v1613_v15 = vld [vmem:[#allocation8 + $0x208] sm:$0xf0]  ;;  %v1255_v19 = vor.u32 %v1571_v9, %v1254_v8  ;;  %v1242_v23 = vld [vmem:[#allocation8 + $0x98] sm:$0xf]  ;;  %v1568_v24 = vld [vmem:[#allocation8 + $0xa0] sm:$0xf0] }
  0x42   :  { %802 = vmatpush.bf16.msra.mxu0 %v1347_v40  ;;  %v1455_v40 = vor.u32 %v1620_v38, %v1452_v39  ;;  %v1592_v27 = vld [vmem:[#allocation8 + $0x160] sm:$0xf0]  ;;  %v1410_v28 = vld [vmem:[#allocation8 + $0x1e8] sm:$0xf]  ;;  %v1610_v29 = vld [vmem:[#allocation8 + $0x1f0] sm:$0xf0]  ;;  %v1243_v31 = vor.u32 %v1568_v24, %v1242_v23 }
  0x43   :  { %795 = vmatpush.bf16.msra.mxu3 %v1179_v30  ;;  %v1230_v35 = vld [vmem:[#allocation8 + $0x80] sm:$0xf]  ;;  %v1565_v36 = vld [vmem:[#allocation8 + $0x88] sm:$0xf0]  ;;  %v1398_v39 = vld [vmem:[#allocation8 + $0x1d0] sm:$0xf] }
  0x44   :  { %815 = vmatpush.bf16.msra.mxu1 %v1443_v46  ;;  %v1359_v46 = vor.u32 %v1596_v44, %v1356_v45  ;;  %v1589_v38 = vld [vmem:[#allocation8 + $0x148] sm:$0xf0]  ;;  %v1231_v41 = vor.u32 %v1565_v36, %v1230_v35  ;;  %v1562_v44 = vld [vmem:[#allocation8 + $0x70] sm:$0xf0]  ;;  %vm1058_vm2 = vcmask 1045504   ;;  %vm1054_vm3 = vcmask 359424  }
  0x45   :  { %835 = vmatpush.bf16.msra.mxu2 %v1455_v40  ;;  %v1607_v40 = vld [vmem:[#allocation8 + $0x1d8] sm:$0xf0]  ;;  %v1601_v60 = vld [vmem:[#allocation8 + $0x1a8] sm:$0xf0]  ;;  %v1598_v8 = vld [vmem:[#allocation8 + $0x190] sm:$0xf0] }
  0x46   :  { %803 = vmatpush.bf16.msra.mxu0 %v1335_v47  ;;  %v111_v47 = vld [vmem:[#allocation7] sm:$0xf]  ;;  %v1399_v45 = vor.u32 %v1607_v40, %v1398_v39  ;;  %s1820_s30 = smov [#allocation11]   ;;  %s1112_s11 = sshll.u32 %s1919_s7, 4  ;;  %s1113_s11 = int_to_ptr.hbm [resolvable:$true] %s1112_s11 }
  0x47   :  { %796 = vmatpush.bf16.msra.mxu3 %v1167_v37  ;;  %v113_v48 = vperm.slane %v111_v47, 0  ;;  %v114_v49 = vperm.slane %v111_v47, 1  ;;  %v115_v58 = vperm.slane %v111_v47, 2  ;;  %v116_v63 = vperm.slane %v111_v47, 3  ;;  %v1326_v37 = vld [vmem:[#allocation8 + $0x140] sm:$0xf] }
  0x48   :  { %816 = vmatpush.bf16.msra.mxu1 %v1431_v52  ;;  %v1327_v42 = vor.u32 %v1589_v38, %v1326_v37  ;;  %v1586_v47 = vld [vmem:[#allocation8 + $0x130] sm:$0xf0]  ;;  %v1632_v37 = vld [vmem:[#allocation10 + $0x48] sm:$0xff]  ;;  %v1631_v39 = vld [vmem:[#allocation10 + $0x40] sm:$0xff]  ;;  %s1110_s8 = sshll.u32 %s1820_s30, 4  ;;  %s1111_s8 = int_to_ptr.vmem [resolvable:$true] %s1110_s8 }
  0x4a   :  { %804 = vmatpush.bf16.msra.mxu0 %v1323_v53  ;;  %v1446_v53 = vld [vmem:[#allocation8 + $0x230] sm:$0xf] }
  0x4c   :  { %817 = vmatpush.bf16.msra.mxu1 %v1419_v1  ;;  %v1616_v1 = vld [vmem:[#allocation8 + $0x220] sm:$0xf0] }
  0x4d   :  { %v1435_v7 = vor.u32 %v1616_v1, %v1434_v0  ;;  %v1194_v0 = vld [vmem:[#allocation8 + $0x38] sm:$0xf]  ;;  %v1556_v1 = vld [vmem:[#allocation8 + $0x40] sm:$0xf0] }
  0x4e   :  { %805 = vmatpush.bf16.msra.mxu0 %v1311_v56  ;;  %v1195_v9 = vor.u32 %v1556_v1, %v1194_v0 }
  0x50   :  { %818 = vmatpush.bf16.msra.mxu1 %v1407_v13  ;;  %v1595_v13 = vld [vmem:[#allocation8 + $0x178] sm:$0xf0] }
  0x52   :  { %806 = vmatpush.bf16.msra.mxu0 %v1299_v59  ;;  %v1447_v59 = vor.u32 %v1619_v54, %v1446_v53  ;;  %v1206_v53 = vld [vmem:[#allocation8 + $0x50] sm:$0xf]  ;;  %v1559_v54 = vld [vmem:[#allocation8 + $0x58] sm:$0xf0] }
  0x53   :  { %v1207_v61 = vor.u32 %v1559_v54, %v1206_v53  ;;  %v1640_v54 = vld [vmem:[#allocation10 + $0x88] sm:$0xff] }
  0x54   :  { %819 = vmatpush.bf16.msra.mxu1 %v1395_v25  ;;  %v1338_v25 = vld [vmem:[#allocation8 + $0x158] sm:$0xf] }
  0x55   :  { %v1339_v33 = vor.u32 %v1592_v27, %v1338_v25  ;;  %v1627_v25 = vld [vmem:[#allocation10 + $0x20] sm:$0xff]  ;;  %v1626_v27 = vld [vmem:[#allocation10 + $0x18] sm:$0xff] }
  0x56   :  { %807 = vmatpush.bf16.msra.mxu0 %v1287_v62 }
  0x58   :  { %820 = vmatpush.bf16.msra.mxu1 %v1383_v34  ;;  %v1411_v34 = vor.u32 %v1610_v29, %v1410_v28  ;;  %v1625_v28 = vld [vmem:[#allocation10 + $0x10] sm:$0xff]  ;;  %v1638_v29 = vld [vmem:[#allocation10 + $0x78] sm:$0xff] }
  0x5a   :  { %808 = vmatpush.bf16.msra.mxu0 %v1275_v10  ;;  %v1350_v10 = vld [vmem:[#allocation8 + $0x170] sm:$0xf] }
  0x5b   :  { %v1351_v21 = vor.u32 %v1595_v13, %v1350_v10 }
  0x5c   :  { %821 = vmatpush.bf16.msra.mxu1 %v1371_v43  ;;  %v1218_v43 = vld [vmem:[#allocation8 + $0x68] sm:$0xf] }
  0x5e   :  { %809 = vmatpush.bf16.msra.mxu0 %v1263_v22  ;;  %v1423_v22 = vor.u32 %v1613_v15, %v1422_v14  ;;  %v1278_v14 = vld [vmem:[#allocation8 + $0xe0] sm:$0xf]  ;;  %v1577_v15 = vld [vmem:[#allocation8 + $0xe8] sm:$0xf0] }
  0x60   :  { %822 = vmatpush.bf16.msra.mxu1 %v1359_v46  ;;  %v1314_v46 = vld [vmem:[#allocation8 + $0x128] sm:$0xf] }
  0x9e   :  { %v174_v50 = vpop.f32.mrf.mxu0 }
  0x9f   :  { %v175_v51 = vadd.f32 %v174_v50, %v113_v48  ;;  %v187_v52 = vpop.f32.mrf.mxu1  ;;  %v1630_v48 = vld [vmem:[#allocation10 + $0x38] sm:$0xff]  ;;  %v1604_v50 = vld [vmem:[#allocation8 + $0x1c0] sm:$0xf0] }
  0xa0   :  { %v188_v55 = vadd.f32 %v187_v52, %v114_v49  ;;  %v1386_v49 = vld [vmem:[#allocation8 + $0x1b8] sm:$0xf]  ;;  %v1315_v52 = vor.u32 %v1586_v47, %v1314_v46 }
  0xa1   :  { %v217_v56 = vmax.f32 %v175_v51, 0.0  ;;  %v1219_v51 = vor.u32 %v1562_v44, %v1218_v43  ;;  %v1537_v43 = vld [vmem:[#allocation10 + $0x90] sm:$0xf]  ;;  %v1641_v44 = vld [vmem:[#allocation10 + $0x90] sm:$0x30] }
  0xa2   :  { %v218_v57 = vmax.f32 %v188_v55, 0.0  ;;  %v1387_v55 = vor.u32 %v1604_v50, %v1386_v49 }
  0xa3   :  { %v1880_v62 = vpack.c.bf16 %v217_v56, %v217_v56  ;;  %v1302_v56 = vld [vmem:[#allocation8 + $0x110] sm:$0xf] }
  0xa4   :  { %v1882_v3 = vpack.c.bf16 %v218_v57, %v218_v57  ;;  %v1583_v57 = vld [vmem:[#allocation8 + $0x118] sm:$0xf0] }
  0xa5   :  { %745 = vmatmul.bf16.vlgmr.msrb.gmra.mxu0 %v1880_v62 }
  0xa6   :  { %v200_v4 = vpop.f32.mrf.mxu2  ;;  %v213_v6 = vpop.f32.mrf.mxu3  ;;  %758 = vmatmul.bf16.vlgmr.msrb.gmra.mxu1 %v1882_v3  ;;  %867 = vmatpush.bf16.msrb.mxu0 %v1447_v59  ;;  %v1374_v59 = vld [vmem:[#allocation8 + $0x1a0] sm:$0xf] }
  0xa7   :  { %v201_v5 = vadd.f32 %v200_v4, %v115_v58  ;;  %v176_v11 = vpop.f32.mrf.mxu0  ;;  %v214_v12 = vadd.f32 %v213_v6, %v116_v63  ;;  %v189_v16 = vpop.f32.mrf.mxu1  ;;  %887 = vmatpush.bf16.msrb.mxu1 %v1459_v2  ;;  %v1629_v58 = vld [vmem:[#allocation10 + $0x30] sm:$0xff]  ;;  %v1303_v63 = vor.u32 %v1583_v57, %v1302_v56  ;;  %v1375_v2 = vor.u32 %v1601_v60, %v1374_v59  ;;  %v1290_v4 = vld [vmem:[#allocation8 + $0xf8] sm:$0xf]  ;;  %v1628_v6 = vld [vmem:[#allocation10 + $0x28] sm:$0xff] }
  0xa8   :  { %v1182_v11 = vld [vmem:[#allocation8 + $0x20] sm:$0xf] }
  0xa9   :  { %v219_v17 = vmax.f32 %v201_v5, 0.0  ;;  %v220_v18 = vmax.f32 %v214_v12, 0.0  ;;  %v1580_v5 = vld [vmem:[#allocation8 + $0x100] sm:$0xf0]  ;;  %v1553_v12 = vld [vmem:[#allocation8 + $0x28] sm:$0xf0] }
  0xaa   :  { %868 = vmatpush.bf16.msrb.mxu0 %v1435_v7  ;;  %v1362_v7 = vld [vmem:[#allocation8 + $0x188] sm:$0xf]  ;;  %v1291_v10 = vor.u32 %v1580_v5, %v1290_v4  ;;  %v1183_v16 = vor.u32 %v1553_v12, %v1182_v11 }
  0xab   :  { %v1886_v20 = vpack.c.bf16 %v219_v17, %v219_v17  ;;  %v1888_v26 = vpack.c.bf16 %v220_v18, %v220_v18  ;;  %v1363_v13 = vor.u32 %v1598_v8, %v1362_v7  ;;  %v1279_v17 = vor.u32 %v1577_v15, %v1278_v14  ;;  %v1170_v18 = vld [vmem:[#allocation8 + $0x8] sm:$0xf] }
  0xad   :  { %771 = vmatmul.bf16.vlgmr.msrb.gmra.mxu2 %v1886_v20  ;;  %1460 = vmatmul.msk.bf16.vlgmr.msrb.gmra.mxu3 %vm733_vm1, %v1888_v26 }
  0xae   :  { %v202_v30 = vpop.f32.mrf.mxu2  ;;  %841 = vmatpush.bf16.msrb.mxu2 %v1255_v19  ;;  %v215_v32 = vpop.f32.mrf.mxu3  ;;  %854 = vmatpush.bf16.msrb.mxu3 %v1351_v21  ;;  %v1550_v19 = vld [vmem:[#allocation8 + $0x10] sm:$0xf0]  ;;  %v1266_v21 = vld [vmem:[#allocation8 + $0xc8] sm:$0xf] }
  0xaf   :  { %869 = vmatpush.bf16.msrb.mxu0 %v1423_v22  ;;  %v1574_v22 = vld [vmem:[#allocation8 + $0xd0] sm:$0xf0]  ;;  %v1171_v23 = vor.u32 %v1550_v19, %v1170_v18  ;;  %v1624_v30 = vld [vmem:[#allocation10 + $0x8] sm:$0xff]  ;;  %v1635_v32 = vld [vmem:[#allocation10 + $0x60] sm:$0xff] }
  0xb0   :  { %v1267_v24 = vor.u32 %v1574_v22, %v1266_v21 }
  0xb2   :  { %842 = vmatpush.bf16.msrb.mxu2 %v1243_v31  ;;  %855 = vmatpush.bf16.msrb.mxu3 %v1339_v33  ;;  %v1623_v31 = vld [vmem:[#allocation10] sm:$0xff] }
  0xb3   :  { %870 = vmatpush.bf16.msrb.mxu0 %v1411_v34  ;;  %v325_v33 = vld [vmem:[%s1916_s4] sm:$0x7] }
  0xb4   :  { %v327_v36 = vperm.slane %v325_v33, 0  ;;  %v329_v14 = vperm.slane %v325_v33, 2 }
  0xb5   :  { %810 = vmatmul.bf16.vlgmr.msra.gmra.mxu0 %v1882_v3 }
  0xb6   :  { %843 = vmatpush.bf16.msrb.mxu2 %v1231_v41  ;;  %856 = vmatpush.bf16.msrb.mxu3 %v1327_v42 }
  0xb7   :  { %823 = vmatmul.bf16.vlgmr.msra.gmra.mxu1 %v1886_v20  ;;  %871 = vmatpush.bf16.msrb.mxu0 %v1399_v45  ;;  %v1538_v45 = vor.u32 %v1641_v44, %v1537_v43 }
  0xb8   :  { %1062 = vmatpush.bf16.msra.mxu1 %v1630_v48 }
  0xb9   :  { %v1060_v49 = vsel %vm1058_vm2, %v1538_v45, 0 }
  0xba   :  { %844 = vmatpush.bf16.msrb.mxu2 %v1219_v51  ;;  %857 = vmatpush.bf16.msrb.mxu3 %v1315_v52 }
  0xbb   :  { %872 = vmatpush.bf16.msrb.mxu0 %v1387_v55 }
  0xbc   :  { %1063 = vmatpush.bf16.msra.mxu1 %v1629_v58  ;;  %v1639_v58 = vld [vmem:[#allocation10 + $0x80] sm:$0xff] }
  0xbd   :  { %1461 = vmatmul.msk.bf16.vlgmr.msra.gmra.mxu2 %vm733_vm1, %v1888_v26  ;;  %797 = vmatmul.bf16.vlgmr.msra.gmra.mxu3 %v1880_v62 }
  0xbe   :  { %845 = vmatpush.bf16.msrb.mxu2 %v1207_v61  ;;  %858 = vmatpush.bf16.msrb.mxu3 %v1303_v63  ;;  %v328_v61 = vperm.slane %v325_v33, 1 }
  0xbf   :  { %873 = vmatpush.bf16.msrb.mxu0 %v1375_v2 }
  0xc0   :  { %1064 = vmatpush.bf16.msra.mxu1 %v1628_v6 }
  0xc2   :  { %846 = vmatpush.bf16.msrb.mxu2 %v1195_v9  ;;  %859 = vmatpush.bf16.msrb.mxu3 %v1291_v10 }
  0xc3   :  { %874 = vmatpush.bf16.msrb.mxu0 %v1363_v13 }
  0xc4   :  { %1065 = vmatpush.bf16.msra.mxu1 %v1627_v25 }
  0xc6   :  { %847 = vmatpush.bf16.msrb.mxu2 %v1183_v16  ;;  %860 = vmatpush.bf16.msrb.mxu3 %v1279_v17 }
  0xc7   :  { %875 = vmatmul.bf16.vlgmr.msrb.gmra.mxu0 %v1886_v20  ;;  %1462 = vmatmul.msk.bf16.vlgmr.msrb.gmra.mxu1 %vm733_vm1, %v1888_v26  ;;  %v1637_v20 = vld [vmem:[#allocation10 + $0x70] sm:$0xff]  ;;  %v1636_v26 = vld [vmem:[#allocation10 + $0x68] sm:$0xff] }
  0xc8   :  { %1066 = vmatpush.bf16.msra.mxu1 %v1626_v27 }
  0xca   :  { %848 = vmatpush.bf16.msrb.mxu2 %v1171_v23  ;;  %861 = vmatpush.bf16.msrb.mxu3 %v1267_v24 }
  0xcc   :  { %1067 = vmatpush.bf16.msra.mxu1 %v1625_v28 }
  0xcd   :  { %849 = vmatmul.bf16.vlgmr.msrb.gmra.mxu2 %v1880_v62  ;;  %862 = vmatmul.bf16.vlgmr.msrb.gmra.mxu3 %v1882_v3  ;;  %v1634_v62 = vld [vmem:[#allocation10 + $0x58] sm:$0xff]  ;;  %v1633_v3 = vld [vmem:[#allocation10 + $0x50] sm:$0xff] }
  0xce   :  { %1075 = vmatpush.bf16.msra.mxu2 %v1638_v29  ;;  %1093 = vmatpush.bf16.msra.mxu3 %v1060_v49 }
  0xd0   :  { %1068 = vmatpush.bf16.msra.mxu1 %v1624_v30  ;;  %v1654_v30 = vld [vmem:[%s1918_s6] ss:$0 sm:$0xff] }
  0xd2   :  { %1076 = vmatpush.bf16.msra.mxu2 %v1637_v20  ;;  %1094 = vmatpush.bf16.msra.mxu3 %v1640_v54 }
  0xd4   :  { %1069 = vmatpush.bf16.msra.mxu1 %v1623_v31 }
  0xd6   :  { %1077 = vmatpush.bf16.msra.mxu2 %v1636_v26  ;;  %1095 = vmatpush.bf16.msra.mxu3 %v1639_v58 }
  0xda   :  { %1078 = vmatpush.bf16.msra.mxu2 %v1635_v32 }
  0xde   :  { %1079 = vmatpush.bf16.msra.mxu2 %v1634_v62 }
  0xe2   :  { %1080 = vmatpush.bf16.msra.mxu2 %v1633_v3 }
  0xe6   :  { %1081 = vmatpush.bf16.msra.mxu2 %v1632_v37 }
  0xea   :  { %1082 = vmatpush.bf16.msra.mxu2 %v1631_v39 }
 0x122   :  { %v746_v34 = vpop.f32.mrf.mxu0 }
 0x123   :  { %v759_v35 = vpop.f32.mrf.mxu1  ;;  %v747_v38 = vadd.f32 %v746_v34, %v327_v36 }
 0x125   :  { %v760_v42 = vadd.f32 %v759_v35, %v747_v38 }
 0x12a   :  { %v748_v40 = vpop.f32.mrf.mxu0 }
 0x12b   :  { %v761_v41 = vpop.f32.mrf.mxu1 }
 0x130   :  { %v772_v46 = vpop.f32.mrf.mxu2  ;;  %v785_v48 = vpop.f32.mrf.mxu3 }
 0x131   :  { %v773_v47 = vadd.f32 %v772_v46, %v760_v42 }
 0x132   :  { %v811_v51 = vpop.f32.mrf.mxu0 }
 0x133   :  { %v786_v50 = vadd.f32 %v785_v48, %v773_v47 }
 0x134   :  { %v824_v52 = vpop.f32.mrf.mxu1 }
 0x135   :  { %v893_v53 = vmax.f32 %v786_v50, 0.0 }
 0x137   :  { %v896_v55 = vpack.c.bf16 %v893_v53, %v893_v53 }
 0x138   :  { %v774_v56 = vpop.f32.mrf.mxu2  ;;  %v787_v57 = vpop.f32.mrf.mxu3 }
 0x139   :  { %1070 = vmatmul.bf16.vlgmr.msra.gmra.mxu1 %v896_v55 }
 0x13a   :  { %v813_v59 = vpop.f32.mrf.mxu0 }
 0x13c   :  { %v826_v60 = vpop.f32.mrf.mxu1 }
 0x140   :  { %v837_v63 = vpop.f32.mrf.mxu2  ;;  %v798_v0 = vpop.f32.mrf.mxu3 }
 0x141   :  { %v799_v1 = vadd.f32 %v798_v0, %v328_v61 }
 0x143   :  { %v812_v2 = vadd.f32 %v811_v51, %v799_v1 }
 0x144   :  { %v876_v4 = vpop.f32.mrf.mxu0  ;;  %v889_v5 = vpop.f32.mrf.mxu1 }
 0x145   :  { %v825_v6 = vadd.f32 %v824_v52, %v812_v2 }
 0x147   :  { %v838_v7 = vadd.f32 %v837_v63, %v825_v6 }
 0x148   :  { %v839_v8 = vpop.f32.mrf.mxu2  ;;  %v800_v9 = vpop.f32.mrf.mxu3 }
 0x149   :  { %v894_v10 = vmax.f32 %v838_v7, 0.0 }
 0x14b   :  { %v897_v11 = vpack.c.bf16 %v894_v10, %v894_v10 }
 0x14c   :  { %v878_v12 = vpop.f32.mrf.mxu0  ;;  %v891_v13 = vpop.f32.mrf.mxu1 }
 0x14d   :  { %1083 = vmatmul.bf16.vlgmr.msra.gmra.mxu2 %v897_v11 }
 0x150   :  { %v850_v15 = vpop.f32.mrf.mxu2  ;;  %v863_v17 = vpop.f32.mrf.mxu3 }
 0x151   :  { %v851_v16 = vadd.f32 %v850_v15, %v329_v14 }
 0x153   :  { %v864_v18 = vadd.f32 %v863_v17, %v851_v16 }
 0x155   :  { %v877_v19 = vadd.f32 %v876_v4, %v864_v18 }
 0x157   :  { %v890_v21 = vadd.f32 %v889_v5, %v877_v19 }
 0x158   :  { %v852_v22 = vpop.f32.mrf.mxu2  ;;  %v865_v24 = vpop.f32.mrf.mxu3 }
 0x159   :  { %v895_v23 = vmax.f32 %v890_v21, 0.0 }
 0x15b   :  { %v898_v25 = vpack.c.bf16 %v895_v23, %v895_v23 }
 0x15d   :  { %1539 = vmatmul.msk.bf16.vlgmr.msra.gmra.mxu3 %vm1054_vm3, %v898_v25 }
 0x1b6   :  { %v1071_v27 = vpop.f32.mrf.mxu1 }
 0x1b7   :  { %v1072_v31 = vadd.f32 %v1654_v30, %v1071_v27 }
 0x1be   :  { %v1073_v28 = vpop.f32.mrf.mxu1 }
 0x1d0   :  { %v1084_v29 = vpop.f32.mrf.mxu2 }
 0x1d1   :  { %v1085_v26 = vadd.f32 %v1084_v29, %v1072_v31 }
 0x1d8   :  { %v1086_v20 = vpop.f32.mrf.mxu2 }
 0x1e0   :  { %v1097_v32 = vpop.f32.mrf.mxu3 }
 0x1e1   :  { %v1098_v62 = vadd.f32 %v1097_v32, %v1085_v26 }
 0x1e3   :  { %1655 = vtanh.f32 %v1098_v62 }
 0x1e8   :  { %v1099_v3 = vpop.f32.mrf.mxu3 }
 0x1e9   :  { %v1656_v33 = vpop.eup %1655 }
 0x1ea   :  { %v1102_v34 = vmul.f32 2.0, %v1656_v33 }
 0x1ec   :  { %v1103_v35 = vpack.c.bf16 %v1102_v34, %v1102_v34 }
 0x1ee   :  { %1104 = vst [vmem:[#allocation11] sm:$0xf] %v1103_v35 }
 0x1ef   :  { %1115 = dma.vmem_to_hbm [thread:$0]  %s1111_s8, 64, %s1113_s11, [#allocation4]  }
 0x1f0   :  { %1807 = dma.done.wait [#allocation4], 64  }
 0x1f1   :  { %1808 = vsyncadd [#allocation4], 4294967232 }
 0x1f2   :  { %1120 = vsyncpa [#allocation3], 1 }
 0x1f3   :  { %1121 = vsyncpa [#allocation6], 1 }
 0x1f4   :  { %1122 = vsyncpa [#allocation9], 1 }
 0x1f5   :  { %1123 = vsyncpa [#allocation4], 1 }

</bundles_post_ra>
